<compile_context>
chip_gen: v7x
topology: tpu7x:2x2x1
jax: 0.10.0
libtpu: 0.0.40
codegen_flags: <defaults>
</compile_context>

<pallas_src>
import functools

import jax
import jax.numpy as jnp
from jax.experimental import pallas as pl
from jax.experimental.pallas import tpu as pltpu

LANE = 128  # TPU lane width; hidden is zero-padded to this for lane-dense vregs.


def _round_up(n, m):
    return (n + m - 1) // m * m


def critic_kernel(x_ref, w1_ref, b1_ref, w2_ref, b2_ref, w3_ref, b3_ref, o_ref,
                  *, bf16_tanh):
    bf16 = jnp.bfloat16

    # fc1 + tanh  (bf16 MXU operands, f32 accumulate).
    z1 = (jnp.dot(x_ref[...].astype(bf16), w1_ref[...],
                  preferred_element_type=jnp.float32) + b1_ref[...])
    # bf16 tanh on v6e/v7x (bf16 EUP path); f32 tanh on v5e.
    h1 = jnp.tanh(z1.astype(bf16)) if bf16_tanh else jnp.tanh(z1).astype(bf16)

    # fc2 + tanh
    z2 = (jnp.dot(h1, w2_ref[...], preferred_element_type=jnp.float32)
          + b2_ref[...])
    h2 = jnp.tanh(z2.astype(bf16)) if bf16_tanh else jnp.tanh(z2).astype(bf16)

    # fc3 value head (no activation); w3 is (128, 1), b3 is a (1, 1) scalar bias.
    v = (jnp.dot(h2, w3_ref[...], preferred_element_type=jnp.float32)
         + b3_ref[...])
    o_ref[...] = v.astype(o_ref.dtype)


def _default_bf16_tanh():
    """bf16 EUP tanh exists on v6e/v7x; v5e (and earlier) have no bf16 VPU/EUP."""
    try:
        kind = jax.devices()[0].device_kind.lower()
    except Exception:
        return False
    return any(tag in kind for tag in ("v6", "v7", "tpu7"))


@functools.partial(jax.jit, static_argnames=("block_b", "bf16_tanh"))
def _critic_forward(x, params, block_b, bf16_tanh):
    w1, b1, w2, b2, w3, b3 = params
    B, num_inputs = x.shape
    hidden = w1.shape[1]
    HP = _round_up(hidden, LANE)          # padded hidden width (lane-dense)
    pad_h = HP - hidden

    # Zero-pad hidden to 128 lanes (exact: padded biases are 0 -> tanh(0)=0, and the
    # padded weight rows/cols are 0, so padded columns stay inert through fc2/fc3).
    w1p = jnp.pad(w1, ((0, 0), (0, pad_h))).astype(jnp.bfloat16)
    b1p = jnp.pad(b1, ((0, 0), (0, pad_h)))
    w2p = jnp.pad(w2, ((0, pad_h), (0, pad_h))).astype(jnp.bfloat16)
    b2p = jnp.pad(b2, ((0, 0), (0, pad_h)))
    w3p = jnp.pad(w3, ((0, pad_h), (0, 0))).astype(jnp.bfloat16)

    # Batch tiling: large tiles (few grid steps), multiple of 8 sublanes, and >=2 tiles
    # whenever the batch is big enough so v7x's second TensorCore gets work.
    b8 = _round_up(B, 8)
    tb = _round_up(min(block_b, b8), 8)
    if tb == b8 and b8 >= 512:
        tb = _round_up((b8 + 1) // 2, 8)
    B_pad = _round_up(B, tb)
    if B_pad != B:
        x = jnp.pad(x, ((0, B_pad - B), (0, 0)))
    num_tiles = B_pad // tb

    const = lambda shape: pl.BlockSpec(shape, lambda i: (0, 0))  # VMEM-resident

    flops = 2 * B_pad * (num_inputs * HP + HP * HP + HP * 1)
    bytes_accessed = (
        B_pad * num_inputs * x.dtype.itemsize           # x (only streamed operand)
        + w1p.size * 2 + w2p.size * 2 + w3p.size * 2    # bf16 weights (resident)
        + b1p.size * 4 + b2p.size * 4 + b3.size * 4
        + B_pad * 1 * 4                                 # (B_pad, 1) f32 value output
    )

    kernel = functools.partial(critic_kernel, bf16_tanh=bf16_tanh)
    out = pl.pallas_call(
        kernel,
        out_shape=jax.ShapeDtypeStruct((B_pad, 1), jnp.float32),
        grid=(num_tiles,),
        in_specs=[
            pl.BlockSpec((tb, num_inputs), lambda i: (i, 0)),  # x: streamed per tile
            const(w1p.shape), const(b1p.shape),
            const(w2p.shape), const(b2p.shape),
            const(w3p.shape), const(b3.shape),
        ],
        out_specs=pl.BlockSpec((tb, 1), lambda i: (i, 0)),
        compiler_params=pltpu.CompilerParams(
            dimension_semantics=("parallel",),  # megacore sharding on v7x
        ),
        cost_estimate=pl.CostEstimate(
            flops=flops,
            transcendentals=2 * B_pad * HP,
            bytes_accessed=bytes_accessed,
        ),
    )(x, w1p, b1p, w2p, b2p, w3p, b3)

    return out[:B]  # drop batch padding; shape (B, 1)


def critic_forward(x, params, block_b=2048, bf16_tanh=None):
    """Returns the critic value, shape (batch, 1), float32.

    x may be passed as bf16 by the caller to halve streamed-input DMA bytes
    (the in-kernel cast is then a no-op)."""
    if bf16_tanh is None:
        bf16_tanh = _default_bf16_tanh()
    return _critic_forward(x, params, block_b, bool(bf16_tanh))


def init_params(key, num_inputs, hidden):
    """Deterministic init mimicking PyTorch nn.Linear default (uniform +-1/sqrt(fan_in)),
    followed by Critic.__init__'s fc3.weight *= 0.1, fc3.bias *= 0.0."""
    k1, k2, k3, k4, k5, k6 = jax.random.split(key, 6)

    def uni(k, shape, fan_in):
        bound = 1.0 / jnp.sqrt(fan_in)
        return jax.random.uniform(k, shape, jnp.float32, -bound, bound)

    # stored as (in_features, out_features)
    w1 = uni(k1, (num_inputs, hidden), num_inputs)
    b1 = uni(k2, (1, hidden), num_inputs)
    w2 = uni(k3, (hidden, hidden), hidden)
    b2 = uni(k4, (1, hidden), hidden)
    w3 = uni(k5, (hidden, 1), hidden) * 0.1
    b3 = uni(k6, (1, 1), hidden) * 0.0
    return (w1, b1, w2, b2, w3, b3)


def critic_reference(x, params, match_kernel=True, bf16_tanh=False):
    """Plain-JAX reference. match_kernel=True mirrors the kernel's bf16 MXU inputs
    (and, when bf16_tanh, its bf16 activation path)."""
    w1, b1, w2, b2, w3, b3 = params
    if not match_kernel:
        h1 = jnp.tanh(x @ w1 + b1)
        h2 = jnp.tanh(h1 @ w2 + b2)
        return h2 @ w3 + b3
    bf = jnp.bfloat16
    z1 = jnp.dot(x.astype(bf), w1.astype(bf),
                 preferred_element_type=jnp.float32) + b1
    h1 = jnp.tanh(z1.astype(bf)) if bf16_tanh else jnp.tanh(z1).astype(bf)
    z2 = jnp.dot(h1, w2.astype(bf), preferred_element_type=jnp.float32) + b2
    h2 = jnp.tanh(z2.astype(bf)) if bf16_tanh else jnp.tanh(z2).astype(bf)
    return jnp.dot(h2, w3.astype(bf), preferred_element_type=jnp.float32) + b3


if __name__ == "__main__":
    num_inputs = 16   # hp-style: observation dim
    hidden = 32       # hp.hidden

    key = jax.random.PRNGKey(0)
    k_x, k_x2, k_x3, k_p = jax.random.split(key, 4)
    params = init_params(k_p, num_inputs, hidden)
    use_bf16_tanh = _default_bf16_tanh()

    # Small batch (single grid step).  NOTE: at B~8 the kernel is pure launch overhead;
    # in a real PPO loop, stack many env steps so one call sees thousands of rows.
    x_small = jax.random.normal(k_x, (8, num_inputs), jnp.float32)
    v_small = critic_forward(x_small, params)
    jax.block_until_ready(v_small)
    assert v_small.shape == (8, 1)
    assert jnp.allclose(
        v_small, critic_reference(x_small, params, bf16_tanh=use_bf16_tanh),
        atol=1e-2), "mismatch vs precision-matched reference (small batch)"
    assert jnp.allclose(
        v_small, critic_reference(x_small, params, match_kernel=False),
        atol=5e-2), "mismatch vs f32 reference (small batch)"

    # Mid batch: exercises the >=2-tile split (600 -> 2 tiles of 304) + batch padding.
    x_mid = jax.random.normal(k_x2, (600, num_inputs), jnp.float32)
    v_mid = critic_forward(x_mid, params)
    jax.block_until_ready(v_mid)
    assert v_mid.shape == (600, 1)
    assert jnp.allclose(
        v_mid, critic_reference(x_mid, params, bf16_tanh=use_bf16_tanh),
        atol=1e-2), "mismatch vs precision-matched reference (mid batch)"

    # Larger batch: exercises the block_b cap (2500 -> 2 tiles of 2048 with padding).
    x_big = jax.random.normal(k_x3, (2500, num_inputs), jnp.float32)
    v_big = critic_forward(x_big, params)
    jax.block_until_ready(v_big)
    assert v_big.shape == (2500, 1)
    assert jnp.allclose(
        v_big, critic_reference(x_big, params, bf16_tanh=use_bf16_tanh),
        atol=1e-2), "mismatch vs precision-matched reference (large batch)"

    print("KERNEL_OK")
</pallas_src>

<mosaic_0001>
module attributes {stable_mosaic.version = 11 : i64} {
  func.func @critic_kernel(%arg0: i32, %arg1: memref<8x16xf32, #tpu.memory_space<vmem>>, %arg2: memref<16x128xbf16, #tpu.memory_space<vmem>>, %arg3: memref<1x128xf32, #tpu.memory_space<vmem>>, %arg4: memref<128x128xbf16, #tpu.memory_space<vmem>>, %arg5: memref<1x128xf32, #tpu.memory_space<vmem>>, %arg6: memref<128x1xbf16, #tpu.memory_space<vmem>>, %arg7: memref<1x1xf32, #tpu.memory_space<vmem>>, %arg8: memref<8x1xf32, #tpu.memory_space<vmem>>) attributes {dimension_semantics = [#tpu.dimension_semantics<parallel>], iteration_bounds = array<i64: 1>, scalar_prefetch = 0 : i64, scratch_operands = 0 : i64, tpu.core_type = #tpu.core_type<tc>, window_params = [{transform_indices = @transform_0, window_bounds = array<i64: 8, 16>}, {pipeline_mode = #tpu.pipeline_mode<synchronous>, transform_indices = @transform_1, window_bounds = array<i64: 16, 128>}, {pipeline_mode = #tpu.pipeline_mode<synchronous>, transform_indices = @transform_2, window_bounds = array<i64: 1, 128>}, {pipeline_mode = #tpu.pipeline_mode<synchronous>, transform_indices = @transform_3, window_bounds = array<i64: 128, 128>}, {pipeline_mode = #tpu.pipeline_mode<synchronous>, transform_indices = @transform_4, window_bounds = array<i64: 1, 128>}, {pipeline_mode = #tpu.pipeline_mode<synchronous>, transform_indices = @transform_5, window_bounds = array<i64: 128, 1>}, {pipeline_mode = #tpu.pipeline_mode<synchronous>, transform_indices = @transform_6, window_bounds = array<i64: 1, 1>}, {transform_indices = @transform_7, window_bounds = array<i64: 8, 1>}]} {
    %c0 = arith.constant 0 : index
    %c0_0 = arith.constant 0 : index
    %0 = vector.load %arg1[%c0, %c0_0] : memref<8x16xf32, #tpu.memory_space<vmem>>, vector<8x16xf32>
    %1 = arith.truncf %0 : vector<8x16xf32> to vector<8x16xbf16>
    %c0_1 = arith.constant 0 : index
    %c0_2 = arith.constant 0 : index
    %2 = vector.load %arg2[%c0_1, %c0_2] : memref<16x128xbf16, #tpu.memory_space<vmem>>, vector<16x128xbf16>
    %cst = arith.constant dense<0.000000e+00> : vector<8x128xf32>
    %3 = tpu.matmul %1, %2, %cst {dimension_numbers = #tpu.dot_dimension_numbers<[1], [0], [0], [1], [0, 0, 1, 1], [], []>} : vector<8x16xbf16>, vector<16x128xbf16>, vector<8x128xf32> -> vector<8x128xf32>
    %c0_3 = arith.constant 0 : index
    %c0_4 = arith.constant 0 : index
    %4 = vector.load %arg3[%c0_3, %c0_4] : memref<1x128xf32, #tpu.memory_space<vmem>>, vector<1x128xf32>
    %5 = vector.broadcast %4 : vector<1x128xf32> to vector<8x128xf32>
    %6 = arith.addf %3, %5 : vector<8x128xf32>
    %7 = math.tanh %6 : vector<8x128xf32>
    %8 = arith.truncf %7 : vector<8x128xf32> to vector<8x128xbf16>
    %c0_5 = arith.constant 0 : index
    %c0_6 = arith.constant 0 : index
    %9 = vector.load %arg4[%c0_5, %c0_6] : memref<128x128xbf16, #tpu.memory_space<vmem>>, vector<128x128xbf16>
    %cst_7 = arith.constant dense<0.000000e+00> : vector<8x128xf32>
    %10 = tpu.matmul %8, %9, %cst_7 {dimension_numbers = #tpu.dot_dimension_numbers<[1], [0], [0], [1], [0, 0, 1, 1], [], []>} : vector<8x128xbf16>, vector<128x128xbf16>, vector<8x128xf32> -> vector<8x128xf32>
    %c0_8 = arith.constant 0 : index
    %c0_9 = arith.constant 0 : index
    %11 = vector.load %arg5[%c0_8, %c0_9] : memref<1x128xf32, #tpu.memory_space<vmem>>, vector<1x128xf32>
    %12 = vector.broadcast %11 : vector<1x128xf32> to vector<8x128xf32>
    %13 = arith.addf %10, %12 : vector<8x128xf32>
    %14 = math.tanh %13 : vector<8x128xf32>
    %15 = arith.truncf %14 : vector<8x128xf32> to vector<8x128xbf16>
    %c0_10 = arith.constant 0 : index
    %c0_11 = arith.constant 0 : index
    %16 = vector.load %arg6[%c0_10, %c0_11] : memref<128x1xbf16, #tpu.memory_space<vmem>>, vector<128x1xbf16>
    %cst_12 = arith.constant dense<0.000000e+00> : vector<8x1xf32>
    %17 = tpu.matmul %15, %16, %cst_12 {dimension_numbers = #tpu.dot_dimension_numbers<[1], [0], [0], [1], [0, 0, 1, 1], [], []>} : vector<8x128xbf16>, vector<128x1xbf16>, vector<8x1xf32> -> vector<8x1xf32>
    %c0_13 = arith.constant 0 : index
    %c0_14 = arith.constant 0 : index
    %18 = vector.load %arg7[%c0_13, %c0_14] : memref<1x1xf32, #tpu.memory_space<vmem>>, vector<1x1xf32>
    %19 = vector.broadcast %18 : vector<1x1xf32> to vector<8x1xf32>
    %20 = arith.addf %17, %19 : vector<8x1xf32>
    %c0_15 = arith.constant 0 : index
    %c0_16 = arith.constant 0 : index
    %21 = vector.load %arg8[%c0_15, %c0_16] : memref<8x1xf32, #tpu.memory_space<vmem>>, vector<8x1xf32>
    tpu.vector_store %arg8[%c0_15, %c0_16], %20 {strides = array<i32>} : memref<8x1xf32, #tpu.memory_space<vmem>>, vector<8x1xf32>,
    return
  }
  func.func @transform_0(%arg0: i32) -> (i32, i32) {
    %c0_i32 = arith.constant 0 : i32
    %c0_i32_0 = arith.constant 0 : i32
    return %arg0, %c0_i32 : i32, i32
  }
  func.func @transform_1(%arg0: i32) -> (i32, i32) {
    %c0_i32 = arith.constant 0 : i32
    %c0_i32_0 = arith.constant 0 : i32
    %c0_i32_1 = arith.constant 0 : i32
    return %c0_i32, %c0_i32_0 : i32, i32
  }
  func.func @transform_2(%arg0: i32) -> (i32, i32) {
    %c0_i32 = arith.constant 0 : i32
    %c0_i32_0 = arith.constant 0 : i32
    %c0_i32_1 = arith.constant 0 : i32
    return %c0_i32, %c0_i32_0 : i32, i32
  }
  func.func @transform_3(%arg0: i32) -> (i32, i32) {
    %c0_i32 = arith.constant 0 : i32
    %c0_i32_0 = arith.constant 0 : i32
    %c0_i32_1 = arith.constant 0 : i32
    return %c0_i32, %c0_i32_0 : i32, i32
  }
  func.func @transform_4(%arg0: i32) -> (i32, i32) {
    %c0_i32 = arith.constant 0 : i32
    %c0_i32_0 = arith.constant 0 : i32
    %c0_i32_1 = arith.constant 0 : i32
    return %c0_i32, %c0_i32_0 : i32, i32
  }
  func.func @transform_5(%arg0: i32) -> (i32, i32) {
    %c0_i32 = arith.constant 0 : i32
    %c0_i32_0 = arith.constant 0 : i32
    %c0_i32_1 = arith.constant 0 : i32
    return %c0_i32, %c0_i32_0 : i32, i32
  }
  func.func @transform_6(%arg0: i32) -> (i32, i32) {
    %c0_i32 = arith.constant 0 : i32
    %c0_i32_0 = arith.constant 0 : i32
    %c0_i32_1 = arith.constant 0 : i32
    return %c0_i32, %c0_i32_0 : i32, i32
  }
  func.func @transform_7(%arg0: i32) -> (i32, i32) {
    %c0_i32 = arith.constant 0 : i32
    %c0_i32_0 = arith.constant 0 : i32
    return %arg0, %c0_i32 : i32, i32
  }
}

</mosaic_0001>

<bundles_post_ra>
// kernel: _critic_forward.1
= control target key start
LH: loop header
LB: loop body
LE: loop exit
PB: predicated region body
PF: predicated region fallthrough
CT: control target
= control target key end

     0   :  { %v432_v0 = vmov 0.0   ;;  %vm433_vm0 = vmmov 0   ;;  %vm46_vm1 = vcmask 130048   ;;  %vm316_vm2 = vcmask 7168   ;;  %s560_s1 = inlined_call_operand.vmem [shape: bf16[16,128], index: 1, kind: input, shape index: {}]   ;;  %s561_s0 = inlined_call_operand.vmem [shape: f32[8,16], index: 0, kind: input, shape index: {}]   ;;  %s562_s3 = inlined_call_operand.vmem [shape: bf16[128,128], index: 3, kind: input, shape index: {}]   ;;  %s563_s5 = inlined_call_operand.vmem [shape: bf16[128,1], index: 5, kind: input, shape index: {}]   ;;  %s564_s2 = inlined_call_operand.vmem [shape: f32[1,128], index: 2, kind: input, shape index: {}]   ;;  %s565_s6 = inlined_call_operand.<no memory space> [shape: f32[1,1], index: 6, kind: input, shape index: {}]   ;;  %s566_s4 = inlined_call_operand.vmem [shape: f32[1,128], index: 4, kind: input, shape index: {}]   ;;  %s567_s7 = inlined_call_operand.vmem [shape: f32[8,1], index: 7, kind: output, shape index: {}]  }
   0x1   :  { %363 = vmatprep.subr.bf16.mxu0 %v432_v0  ;;  %v411_v1 = vld [vmem:[%s560_s1] sm:$0xff]   ;;  %365 = vmatprep.mubr.msk.bf16.mxu0 %vm433_vm0, %v432_v0  ;;  %v413_v5 = vld [vmem:[%s562_s3 + $0x8] sm:$0xff]   ;;  %v414_v6 = vld [vmem:[%s562_s3 + $0x10] sm:$0xff]   ;;  %v12_v28 = vstv %s565_s6 }
   0x2   :  { %v29_v2 = vld [vmem:[%s561_s0] sm:$0xff]  ;;  %369 = vmatprep.subr.bf16.mxu1 %v432_v0  ;;  %385 = vmatprep.mubr.msk.bf16.mxu1 %vm433_vm0, %v432_v0  ;;  %v415_v7 = vld [vmem:[%s562_s3 + $0x18] sm:$0xff]   ;;  %v417_v9 = vld [vmem:[%s562_s3 + $0x28] sm:$0xff]   ;;  %13 = vst [vmem:[#allocation2] sm:$0x1] %v12_v28 }
   0x3   :  { %364 = vmatpush3.bf16.msra.mxu0 %v411_v1  ;;  %v30_v3 = vpack.c.bf16 %v29_v2, %v29_v2  ;;  %v412_v4 = vld [vmem:[%s562_s3] sm:$0xff]   ;;  %v418_v10 = vld [vmem:[%s562_s3 + $0x30] sm:$0xff]   ;;  %v419_v11 = vld [vmem:[%s562_s3 + $0x38] sm:$0xff]  }
   0x4   :  { %389 = vmatprep.subr.bf16.mxu0 %v432_v0  ;;  %370 = vmatpush3.bf16.msra.mxu1 %v412_v4  ;;  %v416_v8 = vld [vmem:[%s562_s3 + $0x20] sm:$0xff]   ;;  %v421_v13 = vld [vmem:[%s563_s5 + $0x8] sm:$0xff]   ;;  %v422_v14 = vld [vmem:[%s563_s5 + $0x10] sm:$0xff]  }
   0x5   :  { %371 = vmatprep.subr.bf16.mxu1 %v432_v0  ;;  %v420_v12 = vld [vmem:[%s563_s5] sm:$0xff]   ;;  %v423_v15 = vld [vmem:[%s563_s5 + $0x18] sm:$0xff]   ;;  %v425_v25 = vld [vmem:[%s563_s5 + $0x28] sm:$0xff]  }
   0x6   :  { %366 = vmatmul.mubr.msk.bf16.vlgmr.msra.gmra.mrb[0].mxu0 %vm46_vm1, %v30_v3  ;;  %v322_v16 = vld [vmem:[%s564_s2] ss:$0 sm:$0xff]  ;;  %v426_v26 = vld [vmem:[%s563_s5 + $0x30] sm:$0xff]   ;;  %v427_v27 = vld [vmem:[%s563_s5 + $0x38] sm:$0xff]  }
   0x7   :  { %405 = vmatprep.mubr.msk.bf16.mxu0 %vm433_vm0, %v432_v0  ;;  %390 = vmatpush3.bf16.msra.mxu0 %v420_v12  ;;  %v424_v24 = vld [vmem:[%s563_s5 + $0x20] sm:$0xff]  }
   0x8   :  { %372 = vmatpush3.bf16.msra.mxu1 %v413_v5  ;;  %391 = vmatprep.subr.bf16.mxu0 %v432_v0  ;;  %v325_v29 = vld [vmem:[%s566_s4] ss:$0 sm:$0xff] }
   0x9   :  { %373 = vmatprep.subr.bf16.mxu1 %v432_v0  ;;  %v334_v37 = vld [vmem:[#allocation2] ss:$0 sm:$0xff] }
   0xb   :  { %392 = vmatpush3.bf16.msra.mxu0 %v421_v13 }
   0xc   :  { %374 = vmatpush3.bf16.msra.mxu1 %v414_v6  ;;  %393 = vmatprep.subr.bf16.mxu0 %v432_v0 }
   0xd   :  { %375 = vmatprep.subr.bf16.mxu1 %v432_v0 }
   0xf   :  { %394 = vmatpush3.bf16.msra.mxu0 %v422_v14 }
  0x10   :  { %376 = vmatpush3.bf16.msra.mxu1 %v415_v7  ;;  %395 = vmatprep.subr.bf16.mxu0 %v432_v0 }
  0x11   :  { %377 = vmatprep.subr.bf16.mxu1 %v432_v0 }
  0x13   :  { %396 = vmatpush3.bf16.msra.mxu0 %v423_v15 }
  0x14   :  { %378 = vmatpush3.bf16.msra.mxu1 %v416_v8  ;;  %397 = vmatprep.subr.bf16.mxu0 %v432_v0 }
  0x15   :  { %379 = vmatprep.subr.bf16.mxu1 %v432_v0 }
  0x17   :  { %398 = vmatpush3.bf16.msra.mxu0 %v424_v24 }
  0x18   :  { %380 = vmatpush3.bf16.msra.mxu1 %v417_v9  ;;  %399 = vmatprep.subr.bf16.mxu0 %v432_v0 }
  0x19   :  { %381 = vmatprep.subr.bf16.mxu1 %v432_v0 }
  0x1b   :  { %400 = vmatpush3.bf16.msra.mxu0 %v425_v25 }
  0x1c   :  { %382 = vmatpush3.bf16.msra.mxu1 %v418_v10  ;;  %401 = vmatprep.subr.bf16.mxu0 %v432_v0 }
  0x1d   :  { %383 = vmatprep.subr.bf16.mxu1 %v432_v0 }
  0x1f   :  { %402 = vmatpush3.bf16.msra.mxu0 %v426_v26 }
  0x20   :  { %384 = vmatpush3.bf16.msra.mxu1 %v419_v11  ;;  %403 = vmatprep.subr.bf16.mxu0 %v432_v0 }
  0x23   :  { %404 = vmatpush3.bf16.msra.mxu0 %v427_v27 }
  0xd9   :  { %v84_v17 = vpop.f32.mrb[0].mxu0 }
  0xda   :  { %v85_v18 = vadd.f32 %v322_v16, %v84_v17  ;;  %v367_v19 = vpop.f32.mrb[1].mxu0 }
  0xdb   :  { %v87_v20 = vpop.f32.mrb[2].mxu0 }
  0xdc   :  { %428 = vtanh.f32 %v85_v18  ;;  %v368_v21 = vpop.f32.mrb[3].mxu0 }
  0xe6   :  { %v429_v22 = vpop.eup %428 }
  0xe7   :  { %v91_v23 = vpack.c.bf16 %v429_v22, %v429_v22 }
  0xe9   :  { %386 = vmatmul.mubr.bf16.vlgmr.msra.gmra.mrb[0].mxu1 %v91_v23 }
 0x1bc   :  { %v197_v30 = vpop.f32.mrb[0].mxu1 }
 0x1bd   :  { %v198_v31 = vadd.f32 %v325_v29, %v197_v30  ;;  %v387_v32 = vpop.f32.mrb[1].mxu1 }
 0x1be   :  { %v200_v33 = vpop.f32.mrb[2].mxu1 }
 0x1bf   :  { %430 = vtanh.f32 %v198_v31  ;;  %v388_v34 = vpop.f32.mrb[3].mxu1 }
 0x1c9   :  { %v431_v35 = vpop.eup %430 }
 0x1ca   :  { %v204_v36 = vpack.c.bf16 %v431_v35, %v431_v35 }
 0x1cc   :  { %406 = vmatmul.mubr.bf16.vlgmr.msra.gmra.mrb[4].mxu0 %v204_v36 }
 0x29f   :  { %v310_v38 = vpop.f32.mrb[4].mxu0 }
 0x2a0   :  { %v311_v39 = vadd.f32 %v334_v37, %v310_v38  ;;  %v407_v40 = vpop.f32.mrb[5].mxu0 }
 0x2a1   :  { %v313_v41 = vpop.f32.mrb[6].mxu0 }
 0x2a2   :  { %317 = vst.msk [vmem:[%s567_s7] sm:$0xff] %vm316_vm2, %v311_v39  ;;  %v408_v42 = vpop.f32.mrb[7].mxu0 }

</bundles_post_ra>
